<compile_context>
chip_gen: v6e
topology: v6e:2x2x1
jax: 0.10.0
libtpu: 0.0.40
codegen_flags: <defaults>
</compile_context>

<pallas_src>
import functools

import jax
import jax.numpy as jnp
import numpy as np
from jax.experimental import pallas as pl
from jax.experimental.pallas import tpu as pltpu


_VMEM_LIMIT_BYTES = 40 * 1024 * 1024   # leaves headroom even on v7x (64 MiB)
_TILE_VMEM_BUDGET = 20 * 1024 * 1024   # double-buffered tiles stay under this


def _pick_tile_rows(n_rows, n_chan, itemsize):
    """Largest multiple-of-8 row tile whose double-buffered traffic fits VMEM."""
    if n_rows < 8:
        return n_rows                                  # block == full array dim
    # normalize pass double-buffers x-in + y-out (+ mask): dominant VMEM user
    per_row = 2 * (2 * n_chan * itemsize + itemsize + 8)
    tr = _TILE_VMEM_BUDGET // max(per_row, 1)
    tr = max(8, min(int(tr), 2048, n_rows))
    return (tr // 8) * 8


# ---------------------------------------------------------------------------
# Kernel 1: masked per-channel reduction (sum, sum of squares)
#   grid = (num_parts, row_blocks_per_part); axis 0 "parallel" (megacore),
#   axis 1 "arbitrary" (accumulation into the resident output block).
# ---------------------------------------------------------------------------
def _masked_reduce_kernel(x_ref, m_ref, sum_ref, ssum_ref, *,
                          total_rows, tile_rows, steps_per_core, acc_rows):
    p = pl.program_id(0)
    i = pl.program_id(1)

    @pl.when(i == 0)
    def _():
        sum_ref[...] = jnp.zeros_like(sum_ref)
        ssum_ref[...] = jnp.zeros_like(ssum_ref)

    # Row-validity mask for tail / over-partitioned blocks (unclamped index).
    row0 = (p * steps_per_core + i) * tile_rows
    rows = row0 + jax.lax.broadcasted_iota(jnp.int32, (tile_rows, 1), 0)
    valid = rows < total_rows

    x = x_ref[...].astype(jnp.float32)
    m = m_ref[...].astype(jnp.float32)
    xm = jnp.where(valid, x * m, 0.0)

    # Fold the row tile onto `acc_rows` sublane accumulators: pure VALU adds,
    # no per-step cross-sublane reduce.  Final collapse to (C,) happens in glue.
    c = xm.shape[-1]
    xm3 = xm.reshape(tile_rows // acc_rows, acc_rows, c)
    sum_ref[...] += jnp.sum(xm3, axis=0, keepdims=True)
    ssum_ref[...] += jnp.sum(xm3 * xm3, axis=0, keepdims=True)


def _masked_stats(x2d, m2d, tile_rows):
    R, C = x2d.shape
    nblocks = pl.cdiv(R, tile_rows)
    num_parts = 2                       # v7x has 2 TCs; harmless on 1-TC chips
    steps = pl.cdiv(nblocks, num_parts)
    acc_rows = 8 if tile_rows % 8 == 0 else tile_rows

    def in_map(p, i):
        # Clamp so over-partitioned steps re-read a valid block (their rows are
        # masked out in-kernel via the row-validity check).
        return (jnp.minimum(p * steps + i, nblocks - 1), 0)

    kernel = functools.partial(
        _masked_reduce_kernel,
        total_rows=R, tile_rows=tile_rows,
        steps_per_core=steps, acc_rows=acc_rows)

    part_sum, part_ssum = pl.pallas_call(
        kernel,
        out_shape=(
            jax.ShapeDtypeStruct((num_parts, acc_rows, C), jnp.float32),
            jax.ShapeDtypeStruct((num_parts, acc_rows, C), jnp.float32),
        ),
        grid_spec=pltpu.PrefetchScalarGridSpec(
            num_scalar_prefetch=0,
            grid=(num_parts, steps),
            in_specs=[
                pl.BlockSpec((tile_rows, C), in_map),
                pl.BlockSpec((tile_rows, 1), in_map),
            ],
            out_specs=[
                pl.BlockSpec((1, acc_rows, C), lambda p, i: (p, 0, 0)),
                pl.BlockSpec((1, acc_rows, C), lambda p, i: (p, 0, 0)),
            ],
        ),
        compiler_params=pltpu.CompilerParams(
            dimension_semantics=("parallel", "arbitrary"),
            vmem_limit_bytes=_VMEM_LIMIT_BYTES,
        ),
    )(x2d, m2d)

    sums = part_sum.sum(axis=(0, 1))     # (C,) f32 — tiny glue reduce
    ssums = part_ssum.sum(axis=(0, 1))   # (C,) f32
    return sums, ssums


# ---------------------------------------------------------------------------
# Kernel 2: normalize + affine, folded to o = (x*m)*scale + shift
# ---------------------------------------------------------------------------
def _normalize_kernel(x_ref, m_ref, scale_ref, shift_ref, o_ref):
    xm = x_ref[...].astype(jnp.float32) * m_ref[...].astype(jnp.float32)
    o_ref[...] = (xm * scale_ref[...] + shift_ref[...]).astype(o_ref.dtype)


def _normalize_affine(x2d, m2d, scale, shift, tile_rows):
    R, C = x2d.shape
    nblocks = pl.cdiv(R, tile_rows)
    return pl.pallas_call(
        _normalize_kernel,
        out_shape=jax.ShapeDtypeStruct((R, C), x2d.dtype),
        grid_spec=pltpu.PrefetchScalarGridSpec(
            num_scalar_prefetch=0,
            grid=(nblocks,),
            in_specs=[
                pl.BlockSpec((tile_rows, C), lambda i: (i, 0)),
                pl.BlockSpec((tile_rows, 1), lambda i: (i, 0)),
                pl.BlockSpec((1, C), lambda i: (0, 0)),
                pl.BlockSpec((1, C), lambda i: (0, 0)),
            ],
            out_specs=pl.BlockSpec((tile_rows, C), lambda i: (i, 0)),
        ),
        compiler_params=pltpu.CompilerParams(
            dimension_semantics=("parallel",),
            vmem_limit_bytes=_VMEM_LIMIT_BYTES,
        ),
    )(x2d, m2d, scale, shift)


# ---------------------------------------------------------------------------
# Wrapper replicating MaskBatchNorm3d.forward (training=True path output)
# ---------------------------------------------------------------------------
def mask_batchnorm3d_forward(
    inp,                        # (T, B, C)
    pad_mask,                   # (B, T) bool, True = padding (or None)
    weight, bias,               # (C,) each
    running_mean, running_var,  # (C,) each
    eps=1e-5, momentum=0.05,
    tile_rows=None,
):
    T, B, C = inp.shape
    R = T * B
    # No layout transpose: work directly on rows in (T, B) order.
    x2d = inp.reshape(R, C)

    if pad_mask is not None:
        # pad_mask is (B, T); rows here are in (T, B) order -> transpose the
        # tiny mask only (R elements), never the (R, C) slab.
        mask_tb = 1.0 - jnp.transpose(pad_mask, (1, 0)).astype(x2d.dtype)
        m2d = mask_tb.reshape(R, 1)
        sum_size = (R - pad_mask.sum()).astype(jnp.float32)
    else:
        m2d = jnp.ones((R, 1), dtype=x2d.dtype)
        sum_size = jnp.float32(R)

    if tile_rows is None:
        tile_rows = _pick_tile_rows(R, C, x2d.dtype.itemsize)

    # --- hot path 1: masked per-channel reduction ---
    sums, ssums = _masked_stats(x2d, m2d, tile_rows)        # (C,), (C,) f32

    batch_mean = sums / sum_size                             # (C,)
    batch_var = ssums / sum_size - batch_mean ** 2           # (C,) biased var

    # running-stat momentum update (glue, mirrors torch no_grad block)
    new_running_mean = (1.0 - momentum) * running_mean + momentum * batch_mean
    new_running_var = (1.0 - momentum) * running_var + momentum * batch_var

    rstd = 1.0 / jnp.sqrt(jnp.maximum(batch_var, eps))       # clamp(var, eps)
    w32 = weight.astype(jnp.float32)
    b32 = bias.astype(jnp.float32)
    scale = (rstd * w32).reshape(1, C)                       # (1, C)
    shift = (b32 - batch_mean * rstd * w32).reshape(1, C)    # (1, C)

    # --- hot path 2: normalize + affine ---
    y2d = _normalize_affine(x2d, m2d,
                            scale.astype(jnp.float32),
                            shift.astype(jnp.float32),
                            tile_rows)

    out = y2d.reshape(T, B, C)                               # no transpose needed
    return out, batch_mean, batch_var, new_running_mean, new_running_var


# ---------------------------------------------------------------------------
# Pure-JAX reference of the torch forward (for verification)
# ---------------------------------------------------------------------------
def _reference_forward(inp, pad_mask, weight, bias, eps=1e-5):
    T, B, C = inp.shape
    x = jnp.transpose(inp, (1, 0, 2))
    mask = 1.0 - pad_mask.astype(x.dtype)[..., None]
    xm = x * mask
    sum_size = mask.sum()
    mean = xm.sum(axis=(0, 1)) / sum_size
    var = (xm ** 2).sum(axis=(0, 1)) / sum_size - mean ** 2
    y = (xm - mean) / jnp.sqrt(jnp.maximum(var, eps))
    out = y * weight + bias
    return jnp.transpose(out, (1, 0, 2))


if __name__ == "__main__":
    key = jax.random.PRNGKey(0)
    T, B, C = 8, 2, 32  # small shapes: seq=8, batch=2, num_features=32
    k1, k2 = jax.random.split(key)

    inp = jax.random.normal(k1, (T, B, C), dtype=jnp.float32)
    # padding mask: last 2 timesteps of batch element 1 are padded
    pad_mask = jnp.zeros((B, T), dtype=bool).at[1, -2:].set(True)

    # deterministic parameter init, matching reset_parameters():
    #   weight = ones, bias = zeros, running_mean = zeros, running_var = ones
    weight = jnp.ones((C,), dtype=jnp.float32)
    bias = jnp.zeros((C,), dtype=jnp.float32)
    running_mean = jnp.zeros((C,), dtype=jnp.float32)
    running_var = jnp.ones((C,), dtype=jnp.float32)

    out, bmean, bvar, rmean, rvar = mask_batchnorm3d_forward(
        inp, pad_mask, weight, bias, running_mean, running_var
    )
    jax.block_until_ready(out)

    ref = _reference_forward(inp, pad_mask, weight, bias)
    np.testing.assert_allclose(np.asarray(out), np.asarray(ref), rtol=1e-5, atol=1e-5)

    # check running-stat bookkeeping against a plain-JAX version of the glue
    x_ref = jnp.transpose(inp, (1, 0, 2)) * (1.0 - pad_mask.astype(jnp.float32)[..., None])
    ss = (1.0 - pad_mask.astype(jnp.float32)).sum()
    bmean_ref = x_ref.sum(axis=(0, 1)) / ss
    bvar_ref = (x_ref ** 2).sum(axis=(0, 1)) / ss - bmean_ref ** 2
    np.testing.assert_allclose(np.asarray(bmean), np.asarray(bmean_ref), rtol=1e-5, atol=1e-5)
    np.testing.assert_allclose(np.asarray(bvar), np.asarray(bvar_ref), rtol=1e-5, atol=1e-5)

    print("KERNEL_OK")
</pallas_src>

<mosaic_0001>
module attributes {stable_mosaic.version = 11 : i64} {
  func.func @_masked_reduce_kernel(%arg0: i32, %arg1: i32, %arg2: memref<16x32xf32, #tpu.memory_space<vmem>>, %arg3: memref<16x1xf32, #tpu.memory_space<vmem>>, %arg4: memref<1x8x32xf32, #tpu.memory_space<vmem>>, %arg5: memref<1x8x32xf32, #tpu.memory_space<vmem>>) attributes {dimension_semantics = [#tpu.dimension_semantics<parallel>, #tpu.dimension_semantics<arbitrary>], iteration_bounds = array<i64: 2, 1>, scalar_prefetch = 0 : i64, scratch_operands = 0 : i64, tpu.core_type = #tpu.core_type<tc>, window_params = [{transform_indices = @transform_0, window_bounds = array<i64: 16, 32>}, {transform_indices = @transform_1, window_bounds = array<i64: 16, 1>}, {transform_indices = @transform_2, window_bounds = array<i64: 1, 8, 32>}, {transform_indices = @transform_3, window_bounds = array<i64: 1, 8, 32>}]} {
    %c0_i32 = arith.constant 0 : i32
    %0 = arith.cmpi eq, %arg1, %c0_i32 : i32
    %1 = arith.extui %0 : i1 to i32
    %c0_i32_0 = arith.constant 0 : i32
    %2 = arith.cmpi ne, %1, %c0_i32_0 : i32
    scf.if %2 {
      %cst_19 = arith.constant 0.000000e+00 : f32
      %31 = vector.broadcast %cst_19 : f32 to vector<1x8x32xf32>
      %c0_20 = arith.constant 0 : index
      %c0_21 = arith.constant 0 : index
      %c0_22 = arith.constant 0 : index
      %32 = vector.load %arg4[%c0_20, %c0_21, %c0_22] : memref<1x8x32xf32, #tpu.memory_space<vmem>>, vector<1x8x32xf32>
      tpu.vector_store %arg4[%c0_20, %c0_21, %c0_22], %31 {strides = array<i32>} : memref<1x8x32xf32, #tpu.memory_space<vmem>>, vector<1x8x32xf32>,
      %cst_23 = arith.constant 0.000000e+00 : f32
      %33 = vector.broadcast %cst_23 : f32 to vector<1x8x32xf32>
      %c0_24 = arith.constant 0 : index
      %c0_25 = arith.constant 0 : index
      %c0_26 = arith.constant 0 : index
      %34 = vector.load %arg5[%c0_24, %c0_25, %c0_26] : memref<1x8x32xf32, #tpu.memory_space<vmem>>, vector<1x8x32xf32>
      tpu.vector_store %arg5[%c0_24, %c0_25, %c0_26], %33 {strides = array<i32>} : memref<1x8x32xf32, #tpu.memory_space<vmem>>, vector<1x8x32xf32>,
    } else {
    }
    %c1_i32 = arith.constant 1 : i32
    %3 = arith.muli %arg0, %c1_i32 : i32
    %4 = arith.addi %3, %arg1 : i32
    %c16_i32 = arith.constant 16 : i32
    %5 = arith.muli %4, %c16_i32 : i32
    %6 = tpu.iota {dimensions = array<i32: 0>} : vector<16x1xi32>
    %7 = vector.broadcast %5 : i32 to vector<16x1xi32>
    %8 = arith.addi %7, %6 : vector<16x1xi32>
    %c16_i32_1 = arith.constant 16 : i32
    %9 = vector.broadcast %c16_i32_1 : i32 to vector<16x1xi32>
    %10 = arith.cmpi slt, %8, %9 : vector<16x1xi32>
    %c0 = arith.constant 0 : index
    %c0_2 = arith.constant 0 : index
    %11 = vector.load %arg2[%c0, %c0_2] : memref<16x32xf32, #tpu.memory_space<vmem>>, vector<16x32xf32>
    %c0_3 = arith.constant 0 : index
    %c0_4 = arith.constant 0 : index
    %12 = vector.load %arg3[%c0_3, %c0_4] : memref<16x1xf32, #tpu.memory_space<vmem>>, vector<16x1xf32>
    %13 = vector.broadcast %12 : vector<16x1xf32> to vector<16x32xf32>
    %14 = arith.mulf %11, %13 : vector<16x32xf32>
    %cst = arith.constant 0.000000e+00 : f32
    %15 = vector.shape_cast %10 : vector<16x1xi1> to vector<16x1xi1>
    %16 = vector.broadcast %15 : vector<16x1xi1> to vector<16x32xi1>
    %17 = vector.broadcast %cst : f32 to vector<16x32xf32>
    %18 = arith.select %16, %14, %17 : vector<16x32xi1>, vector<16x32xf32>
    %19 = vector.shape_cast %18 : vector<16x32xf32> to vector<2x8x32xf32>
    %c0_5 = arith.constant 0 : index
    %c0_6 = arith.constant 0 : index
    %c0_7 = arith.constant 0 : index
    %20 = vector.load %arg4[%c0_5, %c0_6, %c0_7] : memref<1x8x32xf32, #tpu.memory_space<vmem>>, vector<1x8x32xf32>
    %cst_8 = arith.constant dense<0.000000e+00> : vector<8x32xf32>
    %21 = vector.multi_reduction <add>, %19, %cst_8 [0] : vector<2x8x32xf32> to vector<8x32xf32>
    %22 = vector.shape_cast %21 : vector<8x32xf32> to vector<1x8x32xf32>
    %23 = arith.addf %20, %22 : vector<1x8x32xf32>
    %c0_9 = arith.constant 0 : index
    %c0_10 = arith.constant 0 : index
    %c0_11 = arith.constant 0 : index
    %24 = vector.load %arg4[%c0_9, %c0_10, %c0_11] : memref<1x8x32xf32, #tpu.memory_space<vmem>>, vector<1x8x32xf32>
    tpu.vector_store %arg4[%c0_9, %c0_10, %c0_11], %23 {strides = array<i32>} : memref<1x8x32xf32, #tpu.memory_space<vmem>>, vector<1x8x32xf32>,
    %c0_12 = arith.constant 0 : index
    %c0_13 = arith.constant 0 : index
    %c0_14 = arith.constant 0 : index
    %25 = vector.load %arg5[%c0_12, %c0_13, %c0_14] : memref<1x8x32xf32, #tpu.memory_space<vmem>>, vector<1x8x32xf32>
    %26 = arith.mulf %19, %19 : vector<2x8x32xf32>
    %cst_15 = arith.constant dense<0.000000e+00> : vector<8x32xf32>
    %27 = vector.multi_reduction <add>, %26, %cst_15 [0] : vector<2x8x32xf32> to vector<8x32xf32>
    %28 = vector.shape_cast %27 : vector<8x32xf32> to vector<1x8x32xf32>
    %29 = arith.addf %25, %28 : vector<1x8x32xf32>
    %c0_16 = arith.constant 0 : index
    %c0_17 = arith.constant 0 : index
    %c0_18 = arith.constant 0 : index
    %30 = vector.load %arg5[%c0_16, %c0_17, %c0_18] : memref<1x8x32xf32, #tpu.memory_space<vmem>>, vector<1x8x32xf32>
    tpu.vector_store %arg5[%c0_16, %c0_17, %c0_18], %29 {strides = array<i32>} : memref<1x8x32xf32, #tpu.memory_space<vmem>>, vector<1x8x32xf32>,
    return
  }
  func.func @transform_0(%arg0: i32, %arg1: i32) -> (i32, i32) {
    %c1_i32 = arith.constant 1 : i32
    %0 = arith.muli %arg0, %c1_i32 : i32
    %1 = arith.addi %0, %arg1 : i32
    %c0_i32 = arith.constant 0 : i32
    %2 = arith.minsi %1, %c0_i32 : i32
    %c0_i32_0 = arith.constant 0 : i32
    %c0_i32_1 = arith.constant 0 : i32
    return %2, %c0_i32_0 : i32, i32
  }
  func.func @transform_1(%arg0: i32, %arg1: i32) -> (i32, i32) {
    %c1_i32 = arith.constant 1 : i32
    %0 = arith.muli %arg0, %c1_i32 : i32
    %1 = arith.addi %0, %arg1 : i32
    %c0_i32 = arith.constant 0 : i32
    %2 = arith.minsi %1, %c0_i32 : i32
    %c0_i32_0 = arith.constant 0 : i32
    %c0_i32_1 = arith.constant 0 : i32
    return %2, %c0_i32_0 : i32, i32
  }
  func.func @transform_2(%arg0: i32, %arg1: i32) -> (i32, i32, i32) {
    %c0_i32 = arith.constant 0 : i32
    %c0_i32_0 = arith.constant 0 : i32
    %c0_i32_1 = arith.constant 0 : i32
    return %arg0, %c0_i32, %c0_i32_0 : i32, i32, i32
  }
  func.func @transform_3(%arg0: i32, %arg1: i32) -> (i32, i32, i32) {
    %c0_i32 = arith.constant 0 : i32
    %c0_i32_0 = arith.constant 0 : i32
    %c0_i32_1 = arith.constant 0 : i32
    return %arg0, %c0_i32, %c0_i32_0 : i32, i32, i32
  }
}

</mosaic_0001>

<bundles_post_ra>
// kernel: tpu_custom_call.1
= control target key start
LH: loop header
LB: loop body
LE: loop exit
PB: predicated region body
PF: predicated region fallthrough
CT: control target
= control target key end

     0   :  { %9 = vsyncpa [#allocation3], 0  ;;  %s835_s0 = inlined_call_operand.vmem [shape: f32[16,32], index: 0, kind: input, shape index: {}]   ;;  %s836_s1 = inlined_call_operand.vmem [shape: f32[16,1], index: 1, kind: input, shape index: {}]   ;;  %s837_s2 = inlined_call_operand.hbm [shape: f32[2,8,32], index: 2, kind: output, shape index: {0}]   ;;  %s838_s3 = inlined_call_operand.hbm [shape: f32[2,8,32], index: 3, kind: output, shape index: {1}]  }
   0x1   :  { %11 = vsyncpa [#allocation3 + $0x1], 0 }
   0x2   :  { %12 = vsyncpa [#allocation5], 0 }
   0x3   :  { %14 = vsyncpa [#allocation5 + $0x1], 0  ;;  %s668_s12 = smov 0   ;;  %s670_s13 = smov 0  }
   0x4   :  { %s672_s14 = smov 0   ;;  %s674_s15 = smov 0  }
   0x5   :  { %s676_s16 = smov 0   ;;  %s678_s17 = smov 0  }
   0x6 LB: > { %s455_s18 = sadd.s32 4294967295, %s642_s17   ;;  %s456_s19 = sadd.s32 4294967294, %s642_s17   ;;  %s642_s17 = sphi %s678_s17, %s20_s17   ;;  %s638_s16 = sphi %s676_s16, %s845_s16   ;;  %s634_s15 = sphi %s674_s15, %s844_s15   ;;  %s630_s14 = sphi %s672_s14, %s843_s14   ;;  %s626_s13 = sphi %s670_s13, %s842_s13   ;;  %s622_s12 = sphi %s668_s12, %s841_s12  }
   0x7   : > { %s32_s20 = sadd.s32 1, %s638_s16  ;;  %s103_s21 = sadd.s32 1, %s630_s14 }
   0x8   : > { %p34_p0 = scmp.ge.s32.totalorder %s32_s20, 2  ;;  %p113_p1 = scmp.ne.s32.totalorder %s630_s14, %s626_s13 }
   0x9   : > { %p114_p2 = scmp.eq.s32.totalorder %s455_s18, 1  ;;  %p119_p3 = scmp.ne.s32.totalorder %s626_s13, %s622_s12 }
   0xa   : > { %s847_s20 = smov (%p34_p0, %s32_s20), 0  ;;  %p120_p5 = scmp.eq.s32.totalorder %s456_s19, 1 }
   0xb   : > { %p708_p4 = por %p114_p2, %p113_p1  ;;  %s100_s23 = ssub.s32 %s638_s16, %s847_s20 }
   0xc   : > { %p459_p6 = scmp.ge.s32.totalorder %s642_s17, 1  ;;  %p101_p7 = scmp.eq.s32.totalorder %s100_s23, 0 }
   0xd   : > { %p715_p8 = por %p120_p5, %p119_p3  ;;  %p194_p9 = scmp.lt.s32.totalorder %s642_s17, 3 }
   0xe   : > { %s721_s25 = scalar_select %p101_p7, %s630_s14, %s103_s21  }
   0xf   : > { %p195_p10 = pnand %p459_p6, %p194_p9 }
  0x10   : > { %p235_p11 = scmp.lt.s32.totalorder (!%p195_p10), %s634_s15, 0  ;;  %s726_s28 = sand.u32 (!%p195_p10), 1, %s626_s13  }
  0x11   : > { %198 = sbr.rel (%p195_p10) target bundleno = 202 (0xca), region = 28  ;;  %s460_s30 = sshll.u32 (!%p195_p10), %s726_s28, 3 }
  0x12   : > { %s732_s7 = scalar_lea.vmem (!%p195_p10), [#allocation2], %s460_s30  ;;  %s736_s8 = scalar_lea.vmem (!%p195_p10), [#allocation4], %s460_s30 }
  0x13   : > { %s466_s9 = sshll.u32 (!%p195_p10), %s634_s15, 4  ;;  %s469_s19 = sshll.u32 (!%p195_p10), %s634_s15, 7 }
  0x14   : > { %s331_s21 = sshll.u32 (!%p195_p10), %s732_s7, 4  ;;  %s344_s23 = sshll.u32 (!%p195_p10), %s736_s8, 4  ;;  %s758_s21 = int_to_ptr.vmem [resolvable:$true] %s331_s21  ;;  %s767_s23 = int_to_ptr.vmem [resolvable:$true] %s344_s23 }
  0x15   : > { %s765_s4 = scalar_lea.hbm (!%p195_p10), %s838_s3, %s469_s19  ;;  %s313_s5 = scalar_lea.sflag (!%p195_p10), [#allocation3], %s726_s28 }
  0x16   : > { %v644_v0 = vmov 0   ;;  %s236_s26 = scalar_select %p235_p11, %s634_s15, 0  ;;  %vm262_vm0 = vcmask 261120   ;;  %v645_v2 = vmov 0.0   ;;  %v267_v4 = vlaneseq }
  0x17   : > { %535 = vset.pattern.permute.xlu0 %v644_v0  ;;  %263 = vst.msk [vmem:[%s732_s7] sm:$0xff] %vm262_vm0, %v645_v2  ;;  %264 = vst.msk [vmem:[%s736_s8] sm:$0xff] %vm262_vm0, %v645_v2  ;;  %v270_v6 = vstv %s466_s9  ;;  %s646_s9 = smov [#allocation2]  }
  0x18   : > { %s462_s27 = sshll.u32 %s236_s26, 1  ;;  %v268_v5 = vshrl.u32 %v267_v4, 7  ;;  %s540_s10 = sshll.u32 %s646_s9, 4  ;;  %s541_s10 = int_to_ptr.vmem [resolvable:$false] %s540_s10 }
  0x19   : > { %p238_p12 = scmp.lt.s32.totalorder %s462_s27, 1  ;;  %s542_s11 = scalar_lea.vmem %s541_s10, 256 }
  0x1a   : > { %v271_v7 = vadd.s32 %v270_v6, %v268_v5  ;;  %v269_v8 = vadd.s32 8, %v268_v5  ;;  %p543_p2 = scmp.lt.s32.totalorder %s758_s21, %s541_s10 }
  0x1b   : > { %s849_s27 = smov (!%p238_p12, %s462_s27), 1 }
  0x1c   : > { %s463_s29 = sshll.u32 %s849_s27, 3  ;;  %vm273_vm1 = vcmp.lt.s32.totalorder %v271_v7, 16  ;;  %v272_v11 = vadd.s32 %v270_v6, %v269_v8 }
  0x1d   : > { %s253_s6 = scalar_lea.vmem %s836_s1, %s463_s29  ;;  %s241_s18 = scalar_lea.vmem %s835_s0, %s463_s29 }
  0x1e   : > { %v277_v1 = vld [vmem:[%s253_s6] sm:$0xff]  ;;  %v278_v3 = vld [vmem:[%s253_s6 + $0x8] sm:$0xff]  ;;  %vm274_vm2 = vcmp.lt.s32.totalorder %v272_v11, 16  ;;  %v304_v26 = vld [vmem:[%s736_s8] sm:$0xff]  ;;  %s756_s29 = scalar_lea.hbm %s837_s2, %s469_s19  ;;  %s536_s6 = scalar_lea.vmem %s758_s21, 128 }
  0x1f   : > { %281 = vperm.xlu0 %535, %v277_v1   ;;  %v275_v9 = vld [vmem:[%s241_s18] sm:$0xff]  ;;  %v276_v13 = vld [vmem:[%s241_s18 + $0x8] sm:$0xff]  ;;  %p537_p13 = scmp.ne.s32.totalorder %s758_s21, %s536_s6  ;;  %p544_p3 = scmp.lt.s32.totalorder %s542_s11, %s536_s6 }
  0x20   : > { %v297_v22 = vld [vmem:[%s732_s7] sm:$0xff] }
  0x21   : > { %p538_p0 = pnand %p537_p13, %p708_p4  ;;  %p545_p5 = por %p544_p3, %p543_p2 }
  0x23   : > { %286 = vperm.xlu0 %535, %v278_v3   ;;  %p539_p1 = pneg %p538_p0 }
  0x25   : > { %p546_p6 = pnand %p545_p5, %p539_p1 }
  0x9a   : > { %v282_v10 = vpop.permute.xlu0 %281 }
  0x9b   : > { %v289_v12 = vmul.f32 %v282_v10, %v275_v9 }
  0x9d   : > { %v295_v14 = vsel %vm273_vm1, %v289_v12, 0.0 }
  0x9e   : > { %v287_v15 = vpop.permute.xlu0 %286  ;;  %v305_v17 = vmul.f32 %v295_v14, %v295_v14  ;;  %v299_v19 = vsel %vm262_vm0, %v295_v14, 0.0 }
  0x9f   : > { %v290_v16 = vmul.f32 %v287_v15, %v276_v13 }
  0xa0   : > { %v307_v24 = vsel %vm262_vm0, %v305_v17, 0.0 }
  0xa1   : > { %v296_v18 = vsel %vm274_vm2, %v290_v16, 0.0 }
  0xa2   : > { %v300_v20 = vsel %vm262_vm0, %v296_v18, 0.0  ;;  %v306_v21 = vmul.f32 %v296_v18, %v296_v18 }
  0xa3   : > { %v301_v23 = vadd.f32 %v300_v20, %v299_v19 }
  0xa4   : > { %v308_v25 = vsel %vm262_vm0, %v306_v21, 0.0 }
  0xa5   : > { %v309_v27 = vadd.f32 %v308_v25, %v307_v24  ;;  %v302_v28 = vadd.f32 %v301_v23, %v297_v22 }
  0xa7   : > { %303 = vst.msk [vmem:[%s732_s7] sm:$0xff] %vm262_vm0, %v302_v28  ;;  %v310_v29 = vadd.f32 %v309_v27, %v304_v26 }
  0xa8   : > { %549 = shalt.err (!%p546_p6)
}
  0xa9   : > { %s550_s7 = scalar_lea.hbm %s756_s29, 128  ;;  %s554_s26 = scalar_lea.hbm %s837_s2, 256 }
  0xaa   : > { %p551_p7 = scmp.ne.s32.totalorder %s756_s29, %s550_s7  ;;  %p555_p11 = scmp.lt.s32.totalorder %s756_s29, %s837_s2 }
  0xab   : > { %p556_p12 = scmp.lt.s32.totalorder %s554_s26, %s550_s7 }
  0xac   : > { %p552_p9 = pnand %p551_p7, %p708_p4 }
  0xad   : > { %p557_p13 = por %p556_p12, %p555_p11 }
  0xae   : > { %p553_p10 = pneg %p552_p9 }
  0xb0   : > { %p558_p0 = pnand %p557_p13, %p553_p10 }
  0xb2   : > { %561 = shalt.err (!%p558_p0)
}
  0xb3   : > { %473 = dma.vmem_to_hbm [thread:$0]  (%p708_p4), %s758_s21, 128, %s756_s29, %s313_s5   ;;  %311 = vst.msk [vmem:[%s736_s8] sm:$0xff] %vm262_vm0, %v310_v29 }
  0xb4   : > { %s318_s30 = scalar_lea.sflag [#allocation5], %s726_s28  ;;  %s562_s6 = scalar_lea.vmem %s767_s23, 128 }
  0xb5   : > { %p563_p1 = scmp.ne.s32.totalorder %s767_s23, %s562_s6  ;;  %s647_s9 = smov [#allocation4]  }
  0xb6   : > { %s566_s10 = sshll.u32 %s647_s9, 4  ;;  %s567_s10 = int_to_ptr.vmem [resolvable:$false] %s566_s10 }
  0xb7   : > { %p564_p2 = pnand %p563_p1, %p708_p4  ;;  %s568_s11 = scalar_lea.vmem %s567_s10, 256 }
  0xb8   : > { %p569_p5 = scmp.lt.s32.totalorder %s767_s23, %s567_s10  ;;  %p570_p6 = scmp.lt.s32.totalorder %s568_s11, %s562_s6 }
  0xb9   : > { %p565_p3 = pneg %p564_p2 }
  0xba   : > { %p571_p7 = por %p570_p6, %p569_p5 }
  0xbc   : > { %p572_p9 = pnand %p571_p7, %p565_p3 }
  0xbe   : > { %575 = shalt.err (!%p572_p9)
}
  0xbf   : > { %s576_s8 = scalar_lea.hbm %s765_s4, 128  ;;  %s580_s29 = scalar_lea.hbm %s838_s3, 256 }
  0xc0   : > { %p577_p10 = scmp.ne.s32.totalorder %s765_s4, %s576_s8  ;;  %p581_p13 = scmp.lt.s32.totalorder %s765_s4, %s838_s3 }
  0xc1   : > { %p582_p0 = scmp.lt.s32.totalorder %s580_s29, %s576_s8 }
  0xc2   : > { %p578_p11 = pnand %p577_p10, %p708_p4 }
  0xc3   : > { %p583_p1 = por %p582_p0, %p581_p13 }
  0xc4   : > { %p579_p12 = pneg %p578_p11 }
  0xc6   : > { %p584_p2 = pnand %p583_p1, %p579_p12 }
  0xc8   : > { %587 = shalt.err (!%p584_p2)
}
  0xc9   : > { %474 = dma.vmem_to_hbm [thread:$0]  (%p708_p4), %s767_s23, 128, %s765_s4, %s318_s30  }
  0xca PF: > { %p484_p3 = scmp.ge.s32.totalorder %s642_s17, 2  ;;  %s356_s18 = sand.u32 1, %s622_s12  }
  0xcb   : > { %s357_s19 = scalar_lea.sflag [#allocation3], %s356_s18 }
  0xcc   : > { %p478_p5 = pnand %p484_p3, %p715_p8 }
  0xce   : > { %p479_p6 = pneg %p478_p5 }
  0xd0   : > { %613 = dma.done.wait (%p479_p6), %s357_s19, 128  }
  0xd1   : > { %615 = vsyncadd (%p479_p6), %s357_s19, 4294967168  ;;  %s366_s26 = scalar_lea.sflag [#allocation5], %s356_s18 }
  0xd2   : > { %617 = dma.done.wait (%p479_p6), %s366_s26, 128  }
  0xd3   : > { %619 = vsyncadd (%p479_p6), %s366_s26, 4294967168  ;;  %s20_s17 = sadd.s32 1, %s642_s17   ;;  %s841_s12 = smov %s626_s13 }
  0xd4   : > { %p17_p7 = scmp.ge.s32.totalorder %s20_s17, 4   ;;  %s842_s13 = smov %s630_s14 }
  0xd5   : > { %s843_s14 = smov %s721_s25  ;;  %s844_s15 = smov %s638_s16 }
  0xd6   : > { %s845_s16 = smov %s847_s20  ;;  %19 = sbr.rel (!%p17_p7) target bundleno = 6 (0x6), region = 87 }
  0xdb   :  { %371 = vsyncpa [#allocation3], 1 }
  0xdc   :  { %373 = vsyncpa [#allocation3 + $0x1], 1 }
  0xdd   :  { %374 = vsyncpa [#allocation5], 1 }
  0xde   :  { %376 = vsyncpa [#allocation5 + $0x1], 1 }

</bundles_post_ra>
